<compile_context>
chip_gen: v5e
topology: v5e:2x2
jax: 0.10.0
libtpu: 0.0.40
codegen_flags: <defaults>
</compile_context>

<pallas_src>
import math

import jax
import jax.numpy as jnp
from jax import lax
from jax.experimental import pallas as pl
from jax.experimental.pallas import tpu as pltpu


def _pick_block_q(n, target):
    """Largest q-tile that is a multiple of 8, divides n, and is <= target.
    Falls back to the full length (always a legal block)."""
    if n <= target:
        return n
    t = (target // 8) * 8
    while t >= 8:
        if n % t == 0:
            return t
        t -= 8
    return n


def _pick_heads_per_group(n_heads, hd, target_width=256):
    """Heads per grid step so the fused projection width hg*hd approaches the
    MXU width (256 on v6e/v7x) while dividing n_heads."""
    hg = max(1, min(n_heads, target_width // max(hd, 1)))
    while n_heads % hg:
        hg -= 1
    return max(hg, 1)


def make_mha_kernel(hg, hd, return_attn, approx_reciprocal):
    def kernel(q_ref, k_ref, v_ref,
               wq_ref, wk_ref, wv_ref, wo_ref,
               bq_ref, bk_ref, bv_ref, bo_ref,
               *out_and_scratch):
        if return_attn:
            o_ref, a_ref, acc_ref = out_and_scratch
        else:
            o_ref, acc_ref = out_and_scratch
            a_ref = None

        g = pl.program_id(2)

        @pl.when(g == 0)
        def _init():
            acc_ref[...] = jnp.zeros_like(acc_ref)

        xq = q_ref[0]        # (tq, hs)  input dtype (bf16-ready)
        xk = k_ref[0]        # (lk, hs)
        xv = v_ref[0]
        cdt = xq.dtype       # MXU input dtype

        # Group-fused projections: one matmul each with N = hg*hd.
        # f32 accumulation + f32 bias; 1/sqrt(hd) already folded into wq/bq.
        qh = (jnp.dot(xq, wq_ref[0], preferred_element_type=jnp.float32)
              + bq_ref[0]).astype(cdt)                         # (tq, hg*hd)
        kh = (jnp.dot(xk, wk_ref[0], preferred_element_type=jnp.float32)
              + bk_ref[0]).astype(cdt)                         # (lk, hg*hd)
        vh = (jnp.dot(xv, wv_ref[0], preferred_element_type=jnp.float32)
              + bv_ref[0]).astype(cdt)                         # (lk, hg*hd)

        z_parts = []
        for j in range(hg):                                    # static unroll
            lo, hi = j * hd, (j + 1) * hd
            qj, kj, vj = qh[:, lo:hi], kh[:, lo:hi], vh[:, lo:hi]

            # Scaled dot-product scores: contract head dims directly (A . B^T).
            ej = lax.dot_general(qj, kj, (((1,), (1,)), ((), ())),
                                 preferred_element_type=jnp.float32)  # (tq, lk)

            # Numerically-stable softmax; reciprocal goes to the EUP slot.
            mj = jnp.max(ej, axis=-1, keepdims=True)
            pj = jnp.exp(ej - mj)
            lj = jnp.sum(pj, axis=-1, keepdims=True)
            invj = pl.reciprocal(lj, approx=True) if approx_reciprocal else 1.0 / lj

            if return_attn:
                aj = pj * invj
                a_ref[0, j] = aj.astype(a_ref.dtype)
                zj = jnp.dot(aj.astype(cdt), vj,
                             preferred_element_type=jnp.float32)      # (tq, hd)
            else:
                # Defer the 1/l scale from (tq, lk) to the (tq, hd) result.
                zj = jnp.dot(pj.astype(cdt), vj,
                             preferred_element_type=jnp.float32) * invj
            z_parts.append(zj)

        z = jnp.concatenate(z_parts, axis=-1).astype(cdt)       # (tq, hg*hd)
        # This group's slice of the output projection, accumulated over groups;
        # contraction dim is hg*hd (MXU-friendly).
        acc_ref[...] += jnp.dot(z, wo_ref[0], preferred_element_type=jnp.float32)

        @pl.when(g == pl.num_programs(2) - 1)
        def _finalize():
            o_ref[0] = (acc_ref[...] + bo_ref[...]).astype(o_ref.dtype)

    return kernel


def multi_head_attention(q, k, v, params, n_heads, *, block_q=256,
                         heads_per_group=None, return_attn=True,
                         approx_reciprocal=True):
    """params: dict with wq, bq, wk, bk, wv, bv, wo, bo (PyTorch-style:
    weight (out, in), bias (out,)).  Returns (o, a) — a is None if
    return_attn=False."""
    bs, lq, hs = q.shape
    lk = k.shape[1]
    assert k.shape == (bs, lk, hs) and v.shape == (bs, lk, hs)
    assert hs % n_heads == 0, "n_hiddens must be divisible by n_heads"
    hd = hs // n_heads
    dt = q.dtype
    scale = 1.0 / math.sqrt(hd)

    hg = heads_per_group or _pick_heads_per_group(n_heads, hd)
    assert n_heads % hg == 0
    n_groups = n_heads // hg
    gw = hg * hd                     # fused projection width per grid step

    tq = _pick_block_q(lq, block_q)
    n_qt = lq // tq

    # ---- weight prep (one-time, wrapper side) -------------------------------
    # (out, in) -> (in, out), output columns split head-major into groups so
    # each group's weight block is a lane-dense (hs, hg*hd) tile.
    def per_group_cols(w, s=None):
        wt = jnp.asarray(w, jnp.float32).T            # (hs_in, hs_out)
        if s is not None:
            wt = wt * s
        return wt.reshape(hs, n_groups, gw).transpose(1, 0, 2).astype(dt)

    wq = per_group_cols(params["wq"], scale)          # scale folded into wq
    wk = per_group_cols(params["wk"])
    wv = per_group_cols(params["wv"])
    # Output projection: (in, out) with the *input* dim split per group.
    wo = jnp.asarray(params["wo"], jnp.float32).T.reshape(n_groups, gw, hs).astype(dt)

    # Biases stay f32 (added to f32 accumulators); scale folded into bq.
    bq = (jnp.asarray(params["bq"], jnp.float32) * scale).reshape(n_groups, 1, gw)
    bk = jnp.asarray(params["bk"], jnp.float32).reshape(n_groups, 1, gw)
    bv = jnp.asarray(params["bv"], jnp.float32).reshape(n_groups, 1, gw)
    bo = jnp.asarray(params["bo"], jnp.float32).reshape(1, hs)

    # ---- VMEM budget (per-generation, with headroom) ------------------------
    try:
        vmem_cap = pltpu.get_tpu_info().vmem_capacity_bytes
    except Exception:
        vmem_cap = 64 * 1024 * 1024
    vmem_limit = min(int(vmem_cap * 3 // 4), 96 * 1024 * 1024)

    # ---- specs ---------------------------------------------------------------
    q_spec = pl.BlockSpec((1, tq, hs), lambda b, qt, g: (b, qt, 0))
    kv_spec = pl.BlockSpec((1, lk, hs), lambda b, qt, g: (b, 0, 0))
    wqkv_spec = pl.BlockSpec((1, hs, gw), lambda b, qt, g: (g, 0, 0))
    wo_spec = pl.BlockSpec((1, gw, hs), lambda b, qt, g: (g, 0, 0))
    bqkv_spec = pl.BlockSpec((1, 1, gw), lambda b, qt, g: (g, 0, 0))
    bo_spec = pl.BlockSpec((1, hs), lambda b, qt, g: (0, 0))

    out_shape = [jax.ShapeDtypeStruct((bs, lq, hs), dt)]
    out_specs = [pl.BlockSpec((1, tq, hs), lambda b, qt, g: (b, qt, 0))]
    if return_attn:
        out_shape.append(jax.ShapeDtypeStruct((bs, n_heads, lq, lk), dt))
        out_specs.append(pl.BlockSpec((1, hg, tq, lk), lambda b, qt, g: (b, g, qt, 0)))

    kernel = make_mha_kernel(hg, hd, return_attn, approx_reciprocal)

    res = pl.pallas_call(
        kernel,
        out_shape=tuple(out_shape),
        grid_spec=pltpu.PrefetchScalarGridSpec(
            num_scalar_prefetch=0,
            grid=(bs, n_qt, n_groups),
            in_specs=[
                q_spec, kv_spec, kv_spec,             # q, k, v
                wqkv_spec, wqkv_spec, wqkv_spec,      # wq, wk, wv (per group)
                wo_spec,                              # wo (per group rows)
                bqkv_spec, bqkv_spec, bqkv_spec,      # bq, bk, bv (per group)
                bo_spec,                              # bo
            ],
            out_specs=out_specs,
            scratch_shapes=[pltpu.VMEM((tq, hs), jnp.float32)],
        ),
        compiler_params=pltpu.CompilerParams(
            dimension_semantics=("parallel", "parallel", "arbitrary"),
            vmem_limit_bytes=vmem_limit,
        ),
    )(q, k, v, wq, wk, wv, wo, bq, bk, bv, bo)

    if return_attn:
        o, a = res
        return o, a
    (o,) = res
    return o, None


def reference_mha(q, k, v, params, n_heads):
    """Pure-JAX reference mirroring the PyTorch forward (dropout = identity)."""
    bs, lq, hs = q.shape
    lk = k.shape[1]
    hd = hs // n_heads

    def lin(x, w, b):
        return x @ w.T + b

    qp = lin(q, params["wq"], params["bq"])
    kp = lin(k, params["wk"], params["bk"])
    vp = lin(v, params["wv"], params["bv"])

    def to_heads(x, l):
        return x.reshape(bs, l, n_heads, hd).transpose(0, 2, 1, 3)

    qh, kh, vh = to_heads(qp, lq), to_heads(kp, lk), to_heads(vp, lk)
    e = jnp.einsum("bhqd,bhkd->bhqk", qh, kh) / math.sqrt(hd)
    a = jax.nn.softmax(e, axis=-1)
    z = jnp.einsum("bhqk,bhkd->bhqd", a, vh)
    z = z.transpose(0, 2, 1, 3).reshape(bs, lq, hs)
    o = lin(z, params["wo"], params["bo"])
    return o, a


if __name__ == "__main__":
    bs, ls, hs, n_heads = 2, 8, 32, 4

    key = jax.random.PRNGKey(0)
    keys = jax.random.split(key, 16)

    q = jax.random.normal(keys[0], (bs, ls, hs), dtype=jnp.float32)
    k = jax.random.normal(keys[1], (bs, ls, hs), dtype=jnp.float32)
    v = jax.random.normal(keys[2], (bs, ls, hs), dtype=jnp.float32)

    # Deterministic params (PyTorch-style shapes: weight (out, in), bias (out,)).
    bound = 1.0 / math.sqrt(hs)
    params = {
        "wq": jax.random.uniform(keys[3], (hs, hs), minval=-bound, maxval=bound),
        "bq": jax.random.uniform(keys[4], (hs,), minval=-bound, maxval=bound),
        "wk": jax.random.uniform(keys[5], (hs, hs), minval=-bound, maxval=bound),
        "bk": jax.random.uniform(keys[6], (hs,), minval=-bound, maxval=bound),
        "wv": jax.random.uniform(keys[7], (hs, hs), minval=-bound, maxval=bound),
        "bv": jax.random.uniform(keys[8], (hs,), minval=-bound, maxval=bound),
        "wo": jax.random.uniform(keys[9], (hs, hs), minval=-bound, maxval=bound),
        "bo": jax.random.uniform(keys[10], (hs,), minval=-bound, maxval=bound),
    }

    o_ref, a_ref = reference_mha(q, k, v, params, n_heads)

    # Full forward (returns attention weights, matches the PyTorch module).
    o, a = multi_head_attention(q, k, v, params, n_heads)
    o = jax.block_until_ready(o)
    a = jax.block_until_ready(a)
    assert o.shape == (bs, ls, hs)
    assert a.shape == (bs, n_heads, ls, ls)
    # Tolerance accounts for the EUP approximate reciprocal in the softmax denom.
    assert jnp.allclose(a, a_ref, atol=2e-3, rtol=2e-3)
    assert jnp.allclose(o, o_ref, atol=2e-3, rtol=2e-3)

    # Fast path: skip the O(ls^2) attention-weights output (deferred 1/l scale).
    o2, a2 = multi_head_attention(q, k, v, params, n_heads, return_attn=False)
    o2 = jax.block_until_ready(o2)
    assert a2 is None
    assert jnp.allclose(o2, o_ref, atol=2e-3, rtol=2e-3)

    print("KERNEL_OK")
</pallas_src>

<mosaic_0001>
module attributes {stable_mosaic.version = 11 : i64} {
  func.func @kernel(%arg0: i32, %arg1: i32, %arg2: i32, %arg3: memref<1x8x32xf32, #tpu.memory_space<vmem>>, %arg4: memref<1x8x32xf32, #tpu.memory_space<vmem>>, %arg5: memref<1x8x32xf32, #tpu.memory_space<vmem>>, %arg6: memref<1x32x32xf32, #tpu.memory_space<vmem>>, %arg7: memref<1x32x32xf32, #tpu.memory_space<vmem>>, %arg8: memref<1x32x32xf32, #tpu.memory_space<vmem>>, %arg9: memref<1x32x32xf32, #tpu.memory_space<vmem>>, %arg10: memref<1x1x32xf32, #tpu.memory_space<vmem>>, %arg11: memref<1x1x32xf32, #tpu.memory_space<vmem>>, %arg12: memref<1x1x32xf32, #tpu.memory_space<vmem>>, %arg13: memref<1x32xf32, #tpu.memory_space<vmem>>, %arg14: memref<1x8x32xf32, #tpu.memory_space<vmem>>, %arg15: memref<1x4x8x8xf32, #tpu.memory_space<vmem>>, %arg16: memref<8x32xf32, #tpu.memory_space<vmem>>) attributes {dimension_semantics = [#tpu.dimension_semantics<parallel>, #tpu.dimension_semantics<parallel>, #tpu.dimension_semantics<arbitrary>], iteration_bounds = array<i64: 2, 1, 1>, scalar_prefetch = 0 : i64, scratch_operands = 1 : i64, tpu.core_type = #tpu.core_type<tc>, window_params = [{transform_indices = @transform_0, window_bounds = array<i64: 1, 8, 32>}, {transform_indices = @transform_1, window_bounds = array<i64: 1, 8, 32>}, {transform_indices = @transform_2, window_bounds = array<i64: 1, 8, 32>}, {transform_indices = @transform_3, window_bounds = array<i64: 1, 32, 32>}, {transform_indices = @transform_4, window_bounds = array<i64: 1, 32, 32>}, {transform_indices = @transform_5, window_bounds = array<i64: 1, 32, 32>}, {transform_indices = @transform_6, window_bounds = array<i64: 1, 32, 32>}, {transform_indices = @transform_7, window_bounds = array<i64: 1, 1, 32>}, {transform_indices = @transform_8, window_bounds = array<i64: 1, 1, 32>}, {transform_indices = @transform_9, window_bounds = array<i64: 1, 1, 32>}, {pipeline_mode = #tpu.pipeline_mode<synchronous>, transform_indices = @transform_10, window_bounds = array<i64: 1, 32>}, {transform_indices = @transform_11, window_bounds = array<i64: 1, 8, 32>}, {transform_indices = @transform_12, window_bounds = array<i64: 1, 4, 8, 8>}]} {
    %c0_i32 = arith.constant 0 : i32
    %0 = arith.cmpi eq, %arg2, %c0_i32 : i32
    %1 = arith.extui %0 : i1 to i32
    %c0_i32_0 = arith.constant 0 : i32
    %2 = arith.cmpi ne, %1, %c0_i32_0 : i32
    scf.if %2 {
      %cst_68 = arith.constant 0.000000e+00 : f32
      %112 = vector.broadcast %cst_68 : f32 to vector<8x32xf32>
      %c0_69 = arith.constant 0 : index
      %c0_70 = arith.constant 0 : index
      %113 = vector.load %arg16[%c0_69, %c0_70] : memref<8x32xf32, #tpu.memory_space<vmem>>, vector<8x32xf32>
      tpu.vector_store %arg16[%c0_69, %c0_70], %112 {strides = array<i32>} : memref<8x32xf32, #tpu.memory_space<vmem>>, vector<8x32xf32>,
    } else {
    }
    %c0 = arith.constant 0 : index
    %c0_1 = arith.constant 0 : index
    %c0_2 = arith.constant 0 : index
    %3 = vector.load %arg3[%c0, %c0_1, %c0_2] : memref<1x8x32xf32, #tpu.memory_space<vmem>>, vector<1x8x32xf32>
    %4 = vector.shape_cast %3 : vector<1x8x32xf32> to vector<8x32xf32>
    %c0_3 = arith.constant 0 : index
    %c0_4 = arith.constant 0 : index
    %c0_5 = arith.constant 0 : index
    %5 = vector.load %arg4[%c0_3, %c0_4, %c0_5] : memref<1x8x32xf32, #tpu.memory_space<vmem>>, vector<1x8x32xf32>
    %6 = vector.shape_cast %5 : vector<1x8x32xf32> to vector<8x32xf32>
    %c0_6 = arith.constant 0 : index
    %c0_7 = arith.constant 0 : index
    %c0_8 = arith.constant 0 : index
    %7 = vector.load %arg5[%c0_6, %c0_7, %c0_8] : memref<1x8x32xf32, #tpu.memory_space<vmem>>, vector<1x8x32xf32>
    %8 = vector.shape_cast %7 : vector<1x8x32xf32> to vector<8x32xf32>
    %c0_9 = arith.constant 0 : index
    %c0_10 = arith.constant 0 : index
    %c0_11 = arith.constant 0 : index
    %9 = vector.load %arg6[%c0_9, %c0_10, %c0_11] : memref<1x32x32xf32, #tpu.memory_space<vmem>>, vector<1x32x32xf32>
    %10 = vector.shape_cast %9 : vector<1x32x32xf32> to vector<32x32xf32>
    %cst = arith.constant dense<0.000000e+00> : vector<8x32xf32>
    %11 = tpu.matmul %4, %10, %cst {dimension_numbers = #tpu.dot_dimension_numbers<[1], [0], [0], [1], [0, 0, 1, 1], [], []>} : vector<8x32xf32>, vector<32x32xf32>, vector<8x32xf32> -> vector<8x32xf32>
    %c0_12 = arith.constant 0 : index
    %c0_13 = arith.constant 0 : index
    %c0_14 = arith.constant 0 : index
    %12 = vector.load %arg10[%c0_12, %c0_13, %c0_14] : memref<1x1x32xf32, #tpu.memory_space<vmem>>, vector<1x1x32xf32>
    %13 = vector.shape_cast %12 : vector<1x1x32xf32> to vector<1x32xf32>
    %14 = vector.broadcast %13 : vector<1x32xf32> to vector<8x32xf32>
    %15 = arith.addf %11, %14 : vector<8x32xf32>
    %c0_15 = arith.constant 0 : index
    %c0_16 = arith.constant 0 : index
    %c0_17 = arith.constant 0 : index
    %16 = vector.load %arg7[%c0_15, %c0_16, %c0_17] : memref<1x32x32xf32, #tpu.memory_space<vmem>>, vector<1x32x32xf32>
    %17 = vector.shape_cast %16 : vector<1x32x32xf32> to vector<32x32xf32>
    %cst_18 = arith.constant dense<0.000000e+00> : vector<8x32xf32>
    %18 = tpu.matmul %6, %17, %cst_18 {dimension_numbers = #tpu.dot_dimension_numbers<[1], [0], [0], [1], [0, 0, 1, 1], [], []>} : vector<8x32xf32>, vector<32x32xf32>, vector<8x32xf32> -> vector<8x32xf32>
    %c0_19 = arith.constant 0 : index
    %c0_20 = arith.constant 0 : index
    %c0_21 = arith.constant 0 : index
    %19 = vector.load %arg11[%c0_19, %c0_20, %c0_21] : memref<1x1x32xf32, #tpu.memory_space<vmem>>, vector<1x1x32xf32>
    %20 = vector.shape_cast %19 : vector<1x1x32xf32> to vector<1x32xf32>
    %21 = vector.broadcast %20 : vector<1x32xf32> to vector<8x32xf32>
    %22 = arith.addf %18, %21 : vector<8x32xf32>
    %c0_22 = arith.constant 0 : index
    %c0_23 = arith.constant 0 : index
    %c0_24 = arith.constant 0 : index
    %23 = vector.load %arg8[%c0_22, %c0_23, %c0_24] : memref<1x32x32xf32, #tpu.memory_space<vmem>>, vector<1x32x32xf32>
    %24 = vector.shape_cast %23 : vector<1x32x32xf32> to vector<32x32xf32>
    %cst_25 = arith.constant dense<0.000000e+00> : vector<8x32xf32>
    %25 = tpu.matmul %8, %24, %cst_25 {dimension_numbers = #tpu.dot_dimension_numbers<[1], [0], [0], [1], [0, 0, 1, 1], [], []>} : vector<8x32xf32>, vector<32x32xf32>, vector<8x32xf32> -> vector<8x32xf32>
    %c0_26 = arith.constant 0 : index
    %c0_27 = arith.constant 0 : index
    %c0_28 = arith.constant 0 : index
    %26 = vector.load %arg12[%c0_26, %c0_27, %c0_28] : memref<1x1x32xf32, #tpu.memory_space<vmem>>, vector<1x1x32xf32>
    %27 = vector.shape_cast %26 : vector<1x1x32xf32> to vector<1x32xf32>
    %28 = vector.broadcast %27 : vector<1x32xf32> to vector<8x32xf32>
    %29 = arith.addf %25, %28 : vector<8x32xf32>
    %30 = vector.extract_strided_slice %15 {offsets = [0, 0], sizes = [8, 8], strides = [1, 1]} : vector<8x32xf32> to vector<8x8xf32>
    %31 = vector.extract_strided_slice %22 {offsets = [0, 0], sizes = [8, 8], strides = [1, 1]} : vector<8x32xf32> to vector<8x8xf32>
    %32 = vector.extract_strided_slice %29 {offsets = [0, 0], sizes = [8, 8], strides = [1, 1]} : vector<8x32xf32> to vector<8x8xf32>
    %cst_29 = arith.constant dense<0.000000e+00> : vector<8x8xf32>
    %33 = tpu.matmul %30, %31, %cst_29 {dimension_numbers = #tpu.dot_dimension_numbers<[1], [1], [0], [0], [0, 0, 1, 0], [], []>} : vector<8x8xf32>, vector<8x8xf32>, vector<8x8xf32> -> vector<8x8xf32>
    %cst_30 = arith.constant dense<0xFF800000> : vector<8xf32>
    %34 = vector.multi_reduction <maximumf>, %33, %cst_30 [1] : vector<8x8xf32> to vector<8xf32>
    %35 = vector.shape_cast %34 : vector<8xf32> to vector<8x1xf32>
    %36 = vector.broadcast %35 : vector<8x1xf32> to vector<8x8xf32>
    %37 = arith.subf %33, %36 : vector<8x8xf32>
    %38 = math.exp %37 : vector<8x8xf32>
    %cst_31 = arith.constant dense<0.000000e+00> : vector<8xf32>
    %39 = vector.multi_reduction <add>, %38, %cst_31 [1] : vector<8x8xf32> to vector<8xf32>
    %40 = vector.shape_cast %39 : vector<8xf32> to vector<8x1xf32>
    %41 = tpu.reciprocal %40 {approx = true} : vector<8x1xf32> -> vector<8x1xf32>
    %42 = vector.broadcast %41 : vector<8x1xf32> to vector<8x8xf32>
    %43 = arith.mulf %38, %42 : vector<8x8xf32>
    %c0_32 = arith.constant 0 : index
    %c0_33 = arith.constant 0 : index
    %c0_34 = arith.constant 0 : index
    %c0_35 = arith.constant 0 : index
    %44 = vector.load %arg15[%c0_32, %c0_33, %c0_34, %c0_35] : memref<1x4x8x8xf32, #tpu.memory_space<vmem>>, vector<1x1x8x8xf32>
    %45 = vector.shape_cast %44 : vector<1x1x8x8xf32> to vector<8x8xf32>
    %46 = vector.shape_cast %43 : vector<8x8xf32> to vector<1x1x8x8xf32>
    tpu.vector_store %arg15[%c0_32, %c0_33, %c0_34, %c0_35], %46 {strides = array<i32>} : memref<1x4x8x8xf32, #tpu.memory_space<vmem>>, vector<1x1x8x8xf32>,
    %cst_36 = arith.constant dense<0.000000e+00> : vector<8x8xf32>
    %47 = tpu.matmul %43, %32, %cst_36 {dimension_numbers = #tpu.dot_dimension_numbers<[1], [0], [0], [1], [0, 0, 1, 1], [], []>} : vector<8x8xf32>, vector<8x8xf32>, vector<8x8xf32> -> vector<8x8xf32>
    %48 = vector.extract_strided_slice %15 {offsets = [0, 8], sizes = [8, 8], strides = [1, 1]} : vector<8x32xf32> to vector<8x8xf32>
    %49 = vector.extract_strided_slice %22 {offsets = [0, 8], sizes = [8, 8], strides = [1, 1]} : vector<8x32xf32> to vector<8x8xf32>
    %50 = vector.extract_strided_slice %29 {offsets = [0, 8], sizes = [8, 8], strides = [1, 1]} : vector<8x32xf32> to vector<8x8xf32>
    %cst_37 = arith.constant dense<0.000000e+00> : vector<8x8xf32>
    %51 = tpu.matmul %48, %49, %cst_37 {dimension_numbers = #tpu.dot_dimension_numbers<[1], [1], [0], [0], [0, 0, 1, 0], [], []>} : vector<8x8xf32>, vector<8x8xf32>, vector<8x8xf32> -> vector<8x8xf32>
    %cst_38 = arith.constant dense<0xFF800000> : vector<8xf32>
    %52 = vector.multi_reduction <maximumf>, %51, %cst_38 [1] : vector<8x8xf32> to vector<8xf32>
    %53 = vector.shape_cast %52 : vector<8xf32> to vector<8x1xf32>
    %54 = vector.broadcast %53 : vector<8x1xf32> to vector<8x8xf32>
    %55 = arith.subf %51, %54 : vector<8x8xf32>
    %56 = math.exp %55 : vector<8x8xf32>
    %cst_39 = arith.constant dense<0.000000e+00> : vector<8xf32>
    %57 = vector.multi_reduction <add>, %56, %cst_39 [1] : vector<8x8xf32> to vector<8xf32>
    %58 = vector.shape_cast %57 : vector<8xf32> to vector<8x1xf32>
    %59 = tpu.reciprocal %58 {approx = true} : vector<8x1xf32> -> vector<8x1xf32>
    %60 = vector.broadcast %59 : vector<8x1xf32> to vector<8x8xf32>
    %61 = arith.mulf %56, %60 : vector<8x8xf32>
    %c0_40 = arith.constant 0 : index
    %c1 = arith.constant 1 : index
    %c0_41 = arith.constant 0 : index
    %c0_42 = arith.constant 0 : index
    %62 = vector.load %arg15[%c0_40, %c1, %c0_41, %c0_42] : memref<1x4x8x8xf32, #tpu.memory_space<vmem>>, vector<1x1x8x8xf32>
    %63 = vector.shape_cast %62 : vector<1x1x8x8xf32> to vector<8x8xf32>
    %64 = vector.shape_cast %61 : vector<8x8xf32> to vector<1x1x8x8xf32>
    tpu.vector_store %arg15[%c0_40, %c1, %c0_41, %c0_42], %64 {strides = array<i32>} : memref<1x4x8x8xf32, #tpu.memory_space<vmem>>, vector<1x1x8x8xf32>,
    %cst_43 = arith.constant dense<0.000000e+00> : vector<8x8xf32>
    %65 = tpu.matmul %61, %50, %cst_43 {dimension_numbers = #tpu.dot_dimension_numbers<[1], [0], [0], [1], [0, 0, 1, 1], [], []>} : vector<8x8xf32>, vector<8x8xf32>, vector<8x8xf32> -> vector<8x8xf32>
    %66 = vector.extract_strided_slice %15 {offsets = [0, 16], sizes = [8, 8], strides = [1, 1]} : vector<8x32xf32> to vector<8x8xf32>
    %67 = vector.extract_strided_slice %22 {offsets = [0, 16], sizes = [8, 8], strides = [1, 1]} : vector<8x32xf32> to vector<8x8xf32>
    %68 = vector.extract_strided_slice %29 {offsets = [0, 16], sizes = [8, 8], strides = [1, 1]} : vector<8x32xf32> to vector<8x8xf32>
    %cst_44 = arith.constant dense<0.000000e+00> : vector<8x8xf32>
    %69 = tpu.matmul %66, %67, %cst_44 {dimension_numbers = #tpu.dot_dimension_numbers<[1], [1], [0], [0], [0, 0, 1, 0], [], []>} : vector<8x8xf32>, vector<8x8xf32>, vector<8x8xf32> -> vector<8x8xf32>
    %cst_45 = arith.constant dense<0xFF800000> : vector<8xf32>
    %70 = vector.multi_reduction <maximumf>, %69, %cst_45 [1] : vector<8x8xf32> to vector<8xf32>
    %71 = vector.shape_cast %70 : vector<8xf32> to vector<8x1xf32>
    %72 = vector.broadcast %71 : vector<8x1xf32> to vector<8x8xf32>
    %73 = arith.subf %69, %72 : vector<8x8xf32>
    %74 = math.exp %73 : vector<8x8xf32>
    %cst_46 = arith.constant dense<0.000000e+00> : vector<8xf32>
    %75 = vector.multi_reduction <add>, %74, %cst_46 [1] : vector<8x8xf32> to vector<8xf32>
    %76 = vector.shape_cast %75 : vector<8xf32> to vector<8x1xf32>
    %77 = tpu.reciprocal %76 {approx = true} : vector<8x1xf32> -> vector<8x1xf32>
    %78 = vector.broadcast %77 : vector<8x1xf32> to vector<8x8xf32>
    %79 = arith.mulf %74, %78 : vector<8x8xf32>
    %c0_47 = arith.constant 0 : index
    %c2 = arith.constant 2 : index
    %c0_48 = arith.constant 0 : index
    %c0_49 = arith.constant 0 : index
    %80 = vector.load %arg15[%c0_47, %c2, %c0_48, %c0_49] : memref<1x4x8x8xf32, #tpu.memory_space<vmem>>, vector<1x1x8x8xf32>
    %81 = vector.shape_cast %80 : vector<1x1x8x8xf32> to vector<8x8xf32>
    %82 = vector.shape_cast %79 : vector<8x8xf32> to vector<1x1x8x8xf32>
    tpu.vector_store %arg15[%c0_47, %c2, %c0_48, %c0_49], %82 {strides = array<i32>} : memref<1x4x8x8xf32, #tpu.memory_space<vmem>>, vector<1x1x8x8xf32>,
    %cst_50 = arith.constant dense<0.000000e+00> : vector<8x8xf32>
    %83 = tpu.matmul %79, %68, %cst_50 {dimension_numbers = #tpu.dot_dimension_numbers<[1], [0], [0], [1], [0, 0, 1, 1], [], []>} : vector<8x8xf32>, vector<8x8xf32>, vector<8x8xf32> -> vector<8x8xf32>
    %84 = vector.extract_strided_slice %15 {offsets = [0, 24], sizes = [8, 8], strides = [1, 1]} : vector<8x32xf32> to vector<8x8xf32>
    %85 = vector.extract_strided_slice %22 {offsets = [0, 24], sizes = [8, 8], strides = [1, 1]} : vector<8x32xf32> to vector<8x8xf32>
    %86 = vector.extract_strided_slice %29 {offsets = [0, 24], sizes = [8, 8], strides = [1, 1]} : vector<8x32xf32> to vector<8x8xf32>
    %cst_51 = arith.constant dense<0.000000e+00> : vector<8x8xf32>
    %87 = tpu.matmul %84, %85, %cst_51 {dimension_numbers = #tpu.dot_dimension_numbers<[1], [1], [0], [0], [0, 0, 1, 0], [], []>} : vector<8x8xf32>, vector<8x8xf32>, vector<8x8xf32> -> vector<8x8xf32>
    %cst_52 = arith.constant dense<0xFF800000> : vector<8xf32>
    %88 = vector.multi_reduction <maximumf>, %87, %cst_52 [1] : vector<8x8xf32> to vector<8xf32>
    %89 = vector.shape_cast %88 : vector<8xf32> to vector<8x1xf32>
    %90 = vector.broadcast %89 : vector<8x1xf32> to vector<8x8xf32>
    %91 = arith.subf %87, %90 : vector<8x8xf32>
    %92 = math.exp %91 : vector<8x8xf32>
    %cst_53 = arith.constant dense<0.000000e+00> : vector<8xf32>
    %93 = vector.multi_reduction <add>, %92, %cst_53 [1] : vector<8x8xf32> to vector<8xf32>
    %94 = vector.shape_cast %93 : vector<8xf32> to vector<8x1xf32>
    %95 = tpu.reciprocal %94 {approx = true} : vector<8x1xf32> -> vector<8x1xf32>
    %96 = vector.broadcast %95 : vector<8x1xf32> to vector<8x8xf32>
    %97 = arith.mulf %92, %96 : vector<8x8xf32>
    %c0_54 = arith.constant 0 : index
    %c3 = arith.constant 3 : index
    %c0_55 = arith.constant 0 : index
    %c0_56 = arith.constant 0 : index
    %98 = vector.load %arg15[%c0_54, %c3, %c0_55, %c0_56] : memref<1x4x8x8xf32, #tpu.memory_space<vmem>>, vector<1x1x8x8xf32>
    %99 = vector.shape_cast %98 : vector<1x1x8x8xf32> to vector<8x8xf32>
    %100 = vector.shape_cast %97 : vector<8x8xf32> to vector<1x1x8x8xf32>
    tpu.vector_store %arg15[%c0_54, %c3, %c0_55, %c0_56], %100 {strides = array<i32>} : memref<1x4x8x8xf32, #tpu.memory_space<vmem>>, vector<1x1x8x8xf32>,
    %cst_57 = arith.constant dense<0.000000e+00> : vector<8x8xf32>
    %101 = tpu.matmul %97, %86, %cst_57 {dimension_numbers = #tpu.dot_dimension_numbers<[1], [0], [0], [1], [0, 0, 1, 1], [], []>} : vector<8x8xf32>, vector<8x8xf32>, vector<8x8xf32> -> vector<8x8xf32>
    %102 = tpu.concatenate %47, %65, %83, %101 in 1 : vector<8x8xf32>, vector<8x8xf32>, vector<8x8xf32>, vector<8x8xf32> -> vector<8x32xf32>
    %c0_58 = arith.constant 0 : index
    %c0_59 = arith.constant 0 : index
    %103 = vector.load %arg16[%c0_58, %c0_59] : memref<8x32xf32, #tpu.memory_space<vmem>>, vector<8x32xf32>
    %c0_60 = arith.constant 0 : index
    %c0_61 = arith.constant 0 : index
    %c0_62 = arith.constant 0 : index
    %104 = vector.load %arg9[%c0_60, %c0_61, %c0_62] : memref<1x32x32xf32, #tpu.memory_space<vmem>>, vector<1x32x32xf32>
    %105 = vector.shape_cast %104 : vector<1x32x32xf32> to vector<32x32xf32>
    %cst_63 = arith.constant dense<0.000000e+00> : vector<8x32xf32>
    %106 = tpu.matmul %102, %105, %cst_63 {dimension_numbers = #tpu.dot_dimension_numbers<[1], [0], [0], [1], [0, 0, 1, 1], [], []>} : vector<8x32xf32>, vector<32x32xf32>, vector<8x32xf32> -> vector<8x32xf32>
    %107 = arith.addf %103, %106 : vector<8x32xf32>
    %c0_64 = arith.constant 0 : index
    %c0_65 = arith.constant 0 : index
    %108 = vector.load %arg16[%c0_64, %c0_65] : memref<8x32xf32, #tpu.memory_space<vmem>>, vector<8x32xf32>
    tpu.vector_store %arg16[%c0_64, %c0_65], %107 {strides = array<i32>} : memref<8x32xf32, #tpu.memory_space<vmem>>, vector<8x32xf32>,
    %c0_i32_66 = arith.constant 0 : i32
    %109 = arith.cmpi eq, %arg2, %c0_i32_66 : i32
    %110 = arith.extui %109 : i1 to i32
    %c0_i32_67 = arith.constant 0 : i32
    %111 = arith.cmpi ne, %110, %c0_i32_67 : i32
    scf.if %111 {
      %c0_68 = arith.constant 0 : index
      %c0_69 = arith.constant 0 : index
      %112 = vector.load %arg16[%c0_68, %c0_69] : memref<8x32xf32, #tpu.memory_space<vmem>>, vector<8x32xf32>
      %c0_70 = arith.constant 0 : index
      %c0_71 = arith.constant 0 : index
      %113 = vector.load %arg13[%c0_70, %c0_71] : memref<1x32xf32, #tpu.memory_space<vmem>>, vector<1x32xf32>
      %114 = vector.broadcast %113 : vector<1x32xf32> to vector<8x32xf32>
      %115 = arith.addf %112, %114 : vector<8x32xf32>
      %c0_72 = arith.constant 0 : index
      %c0_73 = arith.constant 0 : index
      %c0_74 = arith.constant 0 : index
      %116 = vector.load %arg14[%c0_72, %c0_73, %c0_74] : memref<1x8x32xf32, #tpu.memory_space<vmem>>, vector<1x8x32xf32>
      %117 = vector.shape_cast %116 : vector<1x8x32xf32> to vector<8x32xf32>
      %118 = vector.shape_cast %115 : vector<8x32xf32> to vector<1x8x32xf32>
      tpu.vector_store %arg14[%c0_72, %c0_73, %c0_74], %118 {strides = array<i32>} : memref<1x8x32xf32, #tpu.memory_space<vmem>>, vector<1x8x32xf32>,
    } else {
    }
    return
  }
  func.func @transform_0(%arg0: i32, %arg1: i32, %arg2: i32) -> (i32, i32, i32) {
    %c0_i32 = arith.constant 0 : i32
    %c0_i32_0 = arith.constant 0 : i32
    return %arg0, %arg1, %c0_i32 : i32, i32, i32
  }
  func.func @transform_1(%arg0: i32, %arg1: i32, %arg2: i32) -> (i32, i32, i32) {
    %c0_i32 = arith.constant 0 : i32
    %c0_i32_0 = arith.constant 0 : i32
    %c0_i32_1 = arith.constant 0 : i32
    return %arg0, %c0_i32, %c0_i32_0 : i32, i32, i32
  }
  func.func @transform_2(%arg0: i32, %arg1: i32, %arg2: i32) -> (i32, i32, i32) {
    %c0_i32 = arith.constant 0 : i32
    %c0_i32_0 = arith.constant 0 : i32
    %c0_i32_1 = arith.constant 0 : i32
    return %arg0, %c0_i32, %c0_i32_0 : i32, i32, i32
  }
  func.func @transform_3(%arg0: i32, %arg1: i32, %arg2: i32) -> (i32, i32, i32) {
    %c0_i32 = arith.constant 0 : i32
    %c0_i32_0 = arith.constant 0 : i32
    %c0_i32_1 = arith.constant 0 : i32
    return %arg2, %c0_i32, %c0_i32_0 : i32, i32, i32
  }
  func.func @transform_4(%arg0: i32, %arg1: i32, %arg2: i32) -> (i32, i32, i32) {
    %c0_i32 = arith.constant 0 : i32
    %c0_i32_0 = arith.constant 0 : i32
    %c0_i32_1 = arith.constant 0 : i32
    return %arg2, %c0_i32, %c0_i32_0 : i32, i32, i32
  }
  func.func @transform_5(%arg0: i32, %arg1: i32, %arg2: i32) -> (i32, i32, i32) {
    %c0_i32 = arith.constant 0 : i32
    %c0_i32_0 = arith.constant 0 : i32
    %c0_i32_1 = arith.constant 0 : i32
    return %arg2, %c0_i32, %c0_i32_0 : i32, i32, i32
  }
  func.func @transform_6(%arg0: i32, %arg1: i32, %arg2: i32) -> (i32, i32, i32) {
    %c0_i32 = arith.constant 0 : i32
    %c0_i32_0 = arith.constant 0 : i32
    %c0_i32_1 = arith.constant 0 : i32
    return %arg2, %c0_i32, %c0_i32_0 : i32, i32, i32
  }
  func.func @transform_7(%arg0: i32, %arg1: i32, %arg2: i32) -> (i32, i32, i32) {
    %c0_i32 = arith.constant 0 : i32
    %c0_i32_0 = arith.constant 0 : i32
    %c0_i32_1 = arith.constant 0 : i32
    return %arg2, %c0_i32, %c0_i32_0 : i32, i32, i32
  }
  func.func @transform_8(%arg0: i32, %arg1: i32, %arg2: i32) -> (i32, i32, i32) {
    %c0_i32 = arith.constant 0 : i32
    %c0_i32_0 = arith.constant 0 : i32
    %c0_i32_1 = arith.constant 0 : i32
    return %arg2, %c0_i32, %c0_i32_0 : i32, i32, i32
  }
  func.func @transform_9(%arg0: i32, %arg1: i32, %arg2: i32) -> (i32, i32, i32) {
    %c0_i32 = arith.constant 0 : i32
    %c0_i32_0 = arith.constant 0 : i32
    %c0_i32_1 = arith.constant 0 : i32
    return %arg2, %c0_i32, %c0_i32_0 : i32, i32, i32
  }
  func.func @transform_10(%arg0: i32, %arg1: i32, %arg2: i32) -> (i32, i32) {
    %c0_i32 = arith.constant 0 : i32
    %c0_i32_0 = arith.constant 0 : i32
    %c0_i32_1 = arith.constant 0 : i32
    return %c0_i32, %c0_i32_0 : i32, i32
  }
  func.func @transform_11(%arg0: i32, %arg1: i32, %arg2: i32) -> (i32, i32, i32) {
    %c0_i32 = arith.constant 0 : i32
    %c0_i32_0 = arith.constant 0 : i32
    return %arg0, %arg1, %c0_i32 : i32, i32, i32
  }
  func.func @transform_12(%arg0: i32, %arg1: i32, %arg2: i32) -> (i32, i32, i32, i32) {
    %c0_i32 = arith.constant 0 : i32
    %c0_i32_0 = arith.constant 0 : i32
    return %arg0, %arg2, %arg1, %c0_i32 : i32, i32, i32, i32
  }
}

</mosaic_0001>

<bundles_post_ra>
// kernel: tpu_custom_call.1
= control target key start
LH: loop header
LB: loop body
LE: loop exit
PB: predicated region body
PF: predicated region fallthrough
CT: control target
= control target key end

     0   :  { %s2318_s0 = inlined_call_operand.hbm [shape: f32[2,8,32], index: 0, kind: input, shape index: {}]   ;;  %s2319_s1 = inlined_call_operand.hbm [shape: f32[2,8,32], index: 1, kind: input, shape index: {}]   ;;  %s2320_s2 = inlined_call_operand.hbm [shape: f32[2,8,32], index: 2, kind: input, shape index: {}]   ;;  %s2321_s3 = inlined_call_operand.hbm [shape: f32[1,32,32], index: 3, kind: input, shape index: {}]   ;;  %s2322_s4 = inlined_call_operand.hbm [shape: f32[1,32,32], index: 4, kind: input, shape index: {}]   ;;  %s2323_s5 = inlined_call_operand.hbm [shape: f32[1,32,32], index: 5, kind: input, shape index: {}]   ;;  %s2324_s6 = inlined_call_operand.hbm [shape: f32[1,32,32], index: 6, kind: input, shape index: {}]   ;;  %s2325_s7 = inlined_call_operand.vmem [shape: f32[1,1,32], index: 7, kind: input, shape index: {}]   ;;  %s2326_s8 = inlined_call_operand.vmem [shape: f32[1,1,32], index: 8, kind: input, shape index: {}]   ;;  %s2327_s9 = inlined_call_operand.vmem [shape: f32[1,1,32], index: 9, kind: input, shape index: {}]   ;;  %s2328_s10 = inlined_call_operand.vmem [shape: f32[1,32], index: 10, kind: input, shape index: {}]   ;;  %s2329_s11 = inlined_call_operand.hbm [shape: f32[2,8,32], index: 11, kind: output, shape index: {0}]   ;;  %s2330_s12 = inlined_call_operand.hbm [shape: f32[2,4,8,8], index: 12, kind: output, shape index: {1}]  }
   0x1   :  { %2344 = sst [smem:[#allocation30_spill]] %s2318_s0 }
   0x2   :  { %2345 = sst [smem:[#allocation31_spill]] %s2319_s1 }
   0x3   :  { %2346 = sst [smem:[#allocation32_spill]] %s2321_s3 }
   0x4   :  { %2347 = sst [smem:[#allocation33_spill]] %s2322_s4 }
   0x5   :  { %2348 = sst [smem:[#allocation34_spill]] %s2323_s5 }
   0x6   :  { %2349 = sst [smem:[#allocation35_spill]] %s2324_s6 }
   0x7   :  { %2350 = sst [smem:[#allocation36_spill]] %s2328_s10 }
   0x8   :  { %2351 = sst [smem:[#allocation37_spill]] %s2329_s11 }
   0x9   :  { %2352 = sst [smem:[#allocation38_spill]] %s2330_s12 }
   0xa   :  { %18 = vsyncpa [#allocation4], 0 }
   0xb   :  { %20 = vsyncpa [#allocation4 + $0x1], 0 }
   0xc   :  { %21 = vsyncpa [#allocation7], 0 }
   0xd   :  { %23 = vsyncpa [#allocation7 + $0x1], 0 }
   0xe   :  { %24 = vsyncpa [#allocation10], 0 }
   0xf   :  { %25 = vsyncpa [#allocation13], 0 }
  0x10   :  { %26 = vsyncpa [#allocation5], 0 }
  0x11   :  { %28 = vsyncpa [#allocation5 + $0x1], 0 }
  0x12   :  { %29 = vsyncpa [#allocation17], 0 }
  0x13   :  { %31 = vsyncpa [#allocation17 + $0x1], 0  ;;  %s2016_s21 = smov 0   ;;  %s2018_s22 = smov 0  }
  0x14   :  { %s2020_s23 = smov 0   ;;  %s2022_s24 = smov 0  }
  0x15   :  { %s2024_s25 = smov 0   ;;  %s2026_s26 = smov 0  }
  0x16 LB: > { %2353 = sst [smem:[#allocation24_spill]] %s1915_s21  ;;  %s2047_s27 = sadd.s32 4294967295, %s1935_s26   ;;  %s1935_s26 = sphi %s2026_s26, %s37_s26   ;;  %s1931_s25 = sphi %s2024_s25, %s2383_s25   ;;  %s1927_s24 = sphi %s2022_s24, %s2382_s24   ;;  %s1923_s23 = sphi %s2020_s23, %s2386_s23   ;;  %s1919_s22 = sphi %s2018_s22, %s2385_s22   ;;  %s1915_s21 = sphi %s2016_s21, %s2384_s21  }
  0x17   : > { %2354 = sst [smem:[#allocation25_spill]] %s1931_s25  ;;  %p1399_p0 = scmp.ge.s32.totalorder %s1935_s26, 1 }
  0x18   : > { %2355 = sst [smem:[#allocation26_spill]] %s1935_s26  ;;  %p79_p1 = scmp.eq.s32.totalorder %s2047_s27, 0 }
  0x19   : > { %p402_p2 = scmp.lt.s32.totalorder %s1935_s26, 3  ;;  %s2356_s3 = sld [smem:[#allocation32_spill]] }
  0x1a   : > { %s1937_s14 = smov [#allocation9]   ;;  %p1407_p6 = scmp.ge.s32.totalorder %s1935_s26, 2 }
  0x1b   : > { %p2055_p3 = pnand %p1399_p0, %p402_p2  ;;  %s418_s15 = sshll.u32 %s1937_s14, 4  ;;  %s419_s15 = int_to_ptr.vmem [resolvable:$true] %s418_s15 }
  0x1c   : > { %s2359_s5 = sld [smem:[#allocation34_spill]]  ;;  %s2331_s20 = smov 128  }
  0x1d   : > { %p1477_p4 = pneg %p2055_p3  ;;  %s2333_s28 = smov 8  }
  0x1e   : > { %s1940_s29 = smov [#allocation12]   ;;  %s1398_s17 = sadd.s32 4294967294, %s1935_s26  }
  0x1f   : > { %s416_s30 = sshll.u32 %s2356_s3, 4  ;;  %p2063_p5 = pnand %p1477_p4, %p79_p1  ;;  %s417_s30 = int_to_ptr.hbm [resolvable:$true] %s416_s30 }
  0x20   : > { %s452_s14 = sshll.u32 %s1940_s29, 4  ;;  %s56_s18 = sadd.s32 1, %s1931_s25  ;;  %s453_s14 = int_to_ptr.vmem [resolvable:$true] %s452_s14 }
  0x21   : > { %1480 = dma.hbm_to_vmem [thread:$0]  (!%p2063_p5), %s417_s30, 512, %s419_s15, [#allocation10], %s2331_s20, %s2331_s20, %s2333_s28  }
  0x22   : > { %s450_s19 = sshll.u32 %s2359_s5, 4  ;;  %p58_p7 = scmp.ge.s32.totalorder %s56_s18, 2  ;;  %s451_s19 = int_to_ptr.hbm [resolvable:$true] %s450_s19 }
  0x23   : > { %1486 = dma.hbm_to_vmem [thread:$0]  (!%p2063_p5), %s451_s19, 512, %s453_s14, [#allocation13], %s2331_s20, %s2331_s20, %s2333_s28  }
  0x24   : > { %s65_s3 = sadd.s32 1, %s1923_s23  ;;  %p72_p8 = scmp.ne.s32.totalorder %s1923_s23, %s1919_s22 }
  0x25   : > { %p73_p9 = scmp.eq.s32.totalorder %s1935_s26, 0  ;;  %s2388_s18 = smov (%p58_p7, %s56_s18), 0 }
  0x26   : > { %2360 = sst [smem:[#allocation27_spill]] %s2388_s18  ;;  %p78_p11 = scmp.ne.s32.totalorder %s1919_s22, %s1915_s21 }
  0x27   : > { %p2089_p10 = por %p73_p9, %p72_p8  ;;  %s60_s15 = ssub.s32 %s1931_s25, %s2388_s18 }
  0x28   : > { %p359_p12 = scmp.eq.s32.totalorder %s2047_s27, 1  ;;  %p63_p13 = scmp.eq.s32.totalorder %s60_s15, 0 }
  0x29   : > { %p2100_p0 = por %p79_p1, %p78_p11  ;;  %p365_p4 = scmp.eq.s32.totalorder %s1398_s17, 1 }
  0x2a   : > { %p2104_p2 = por %p359_p12, %p72_p8  ;;  %p1511_p9 = scmp.lt.s32.totalorder %s1935_s26, 2 }
  0x2b   : > { %s2109_s14 = scalar_select %p63_p13, %s1923_s23, %s65_s3  }
  0x2c   : > { %p2111_p7 = por %p365_p4, %p78_p11  ;;  %s2339_s28 = sand.u32 1, %s1923_s23  }
  0x2d   : > { %2364 = sst [smem:[#allocation28_spill]] %s2109_s14  ;;  %s2118_s5 = sshll.u32 %s1931_s25, 3 }
  0x2e   : > { %s2365_s20 = scalar_select %p2111_p7, 1, 0 }
  0x2f   : > { %s2122_s15 = sshll.u32 %s2339_s28, 3  ;;  %p2126_p8 = pnand %p1511_p9, %p2089_p10 }
  0x30   : > { %2366 = sst [smem:[#allocation29_spill]] %s2365_s20  ;;  %s524_s3 = sand.u32 1, %s1935_s26  }
  0x31   : > { %s2368_s1 = sld [smem:[#allocation31_spill]]  ;;  %s528_s21 = scalar_lea.vmem [#allocation6], %s2122_s15 }
  0x32   : > { %s536_s25 = sshll.u32 %s528_s21, 4  ;;  %s2369_s4 = sld [smem:[#allocation33_spill]]  ;;  %s537_s25 = int_to_ptr.vmem [resolvable:$true] %s536_s25 }
  0x33   : > { %s525_s12 = scalar_lea.sflag [#allocation7], %s524_s3  ;;  %s1941_s26 = smov [#allocation11]  }
  0x34   : > { %s435_s14 = sshll.u32 %s1941_s26, 4  ;;  %s2370_s6 = sld [smem:[#allocation35_spill]]  ;;  %s436_s14 = int_to_ptr.vmem [resolvable:$true] %s435_s14 }
  0x35   : > { %s2372_s28 = smov 128   ;;  %s1942_s3 = smov [#allocation14]  }
  0x36   : > { %s2373_s0 = sld [smem:[#allocation30_spill]]  ;;  %s508_s17 = scalar_lea.vmem [#allocation3], %s2122_s15 }
  0x37   : > { %s532_s20 = scalar_lea.hbm %s2368_s1, %s2118_s5 }
  0x38   : > { %s534_s10 = sshll.u32 %s532_s20, 4  ;;  %s433_s11 = sshll.u32 %s2369_s4, 4  ;;  %s535_s10 = int_to_ptr.hbm [resolvable:$true] %s534_s10  ;;  %s434_s11 = int_to_ptr.hbm [resolvable:$true] %s433_s11 }
  0x39   : > { %1496 = dma.hbm_to_vmem [thread:$0]  (!%p2126_p8), %s535_s10, 128, %s537_s25, %s525_s12  }
  0x3a   : > { %s467_s21 = sshll.u32 %s2370_s6, 4  ;;  %s2371_s20 = smov 8   ;;  %s468_s21 = int_to_ptr.hbm [resolvable:$true] %s467_s21 }
  0x3b   : > { %1483 = dma.hbm_to_vmem [thread:$0]  (!%p2063_p5), %s434_s11, 512, %s436_s14, [#allocation10], %s2372_s28, %s2372_s28, %s2371_s20  }
  0x3c   : > { %s469_s10 = sshll.u32 %s1942_s3, 4  ;;  %s513_s26 = scalar_lea.hbm %s2373_s0, %s2118_s5  ;;  %s470_s10 = int_to_ptr.vmem [resolvable:$true] %s469_s10 }
  0x3d   : > { %1489 = dma.hbm_to_vmem [thread:$0]  (!%p2063_p5), %s468_s21, 512, %s470_s10, [#allocation13], %s2372_s28, %s2372_s28, %s2371_s20  }
  0x3e   : > { %s515_s1 = sshll.u32 %s513_s26, 4  ;;  %s517_s4 = sshll.u32 %s508_s17, 4  ;;  %s516_s1 = int_to_ptr.hbm [resolvable:$true] %s515_s1  ;;  %s518_s4 = int_to_ptr.vmem [resolvable:$true] %s517_s4 }
  0x3f   : > { %s2374_s6 = sand.u32 1, %s1923_s23   ;;  %s551_s25 = scalar_lea.hbm %s2320_s2, %s2118_s5 }
  0x40   : > { %s505_s11 = scalar_lea.sflag [#allocation4], %s2374_s6  ;;  %s553_s30 = sshll.u32 %s551_s25, 4  ;;  %s554_s30 = int_to_ptr.hbm [resolvable:$true] %s553_s30 }
  0x41   : > { %1493 = dma.hbm_to_vmem [thread:$0]  (!%p2126_p8), %s516_s1, 128, %s518_s4, %s505_s11  }
  0x42   : > { %s547_s0 = scalar_lea.vmem [#allocation8], %s2122_s15  ;;  %564 = sbr.rel (%p2055_p3) target bundleno = 1125 (0x465), region = 64 }
  0x43   : > { %s555_s16 = sshll.u32 %s547_s0, 4  ;;  %s2173_s21 = sand.u32 (!%p2055_p3), 1, %s1919_s22   ;;  %s556_s16 = int_to_ptr.vmem [resolvable:$true] %s555_s16 }
  0x44   : > { %1499 = dma.hbm_to_vmem [thread:$0]  (!%p2126_p8), %s554_s30, 128, %s556_s16, %s525_s12  }
  0x45   : > { %s2176_s4 = sshll.u32 (!%p2055_p3), %s2173_s21, 3  ;;  %s567_s5 = scalar_lea.sflag (!%p2055_p3), [#allocation4], %s2173_s21 }
  0x46   : > { %s570_s6 = scalar_lea.vmem (!%p2055_p3), [#allocation3], %s2176_s4 }
  0x47   : > { %1890 = dma.done.wait (%p2100_p0), %s567_s5, 128  }
  0x48   : > { %1892 = vsyncadd (%p2100_p0), %s567_s5, 4294967168  ;;  %s576_s0 = sand.u32 1, %s2047_s27   ;;  %s580_s13 = scalar_lea.vmem [#allocation6], %s2176_s4 }
  0x49   : > { %s577_s12 = scalar_lea.sflag [#allocation7], %s576_s0 }
  0x4a   : > { %1894 = dma.done.wait (%p2100_p0), %s577_s12, 256  }
  0x4b   : > { %1896 = vsyncadd (%p2100_p0), %s577_s12, 4294967040  ;;  %s590_s18 = scalar_lea.vmem [#allocation8], %s2176_s4 }
  0x4c   : > { %1898 = dma.done.wait (%p79_p1), [#allocation10], 1024  }
  0x4d   : > { %1900 = vsyncadd (%p79_p1), [#allocation10], 4294966272 }
  0x4e   : > { %1902 = dma.done.wait (%p79_p1), [#allocation13], 1024  }
  0x4f   : > { %1904 = vsyncadd (%p79_p1), [#allocation13], 4294966272  ;;  %v730_v0 = vld [vmem:[#allocation11 + $0x18] sm:$0xff]  ;;  %v729_v1 = vld [vmem:[#allocation11 + $0x10] sm:$0xff]  ;;  %vm690_vm0 = vcmask 261120   ;;  %vm789_vm1 = vcmask 64512  }
  0x50   : > { %v698_v2 = vld [vmem:[#allocation9 + $0x18] sm:$0xff]  ;;  %750 = vmatpush.msra.mxu1 %v730_v0  ;;  %v697_v3 = vld [vmem:[#allocation9 + $0x10] sm:$0xff]  ;;  %v728_v4 = vld [vmem:[#allocation11 + $0x8] sm:$0xff]  ;;  %s1943_s28 = smov 104   ;;  %s1944_s10 = smov 120   ;;  %vm1066_vm2 = vcmask 130048  }
  0x51   : > { %719 = vmatpush.msra.mxu0 %v698_v2  ;;  %v696_v5 = vld [vmem:[#allocation9 + $0x8] sm:$0xff]  ;;  %v727_v6 = vld [vmem:[#allocation11] sm:$0xff]  ;;  %v692_v9 = vld [vmem:[%s570_s6] sm:$0xff]  ;;  %s1945_s26 = smov 112   ;;  %s1423_s11 = sshll.u32 %s2173_s21, 5  ;;  %vm1068_vm3 = vcmask 195584  }
  0x52   : > { %751 = vmatpush.msra.mxu1 %v729_v1  ;;  %v695_v7 = vld [vmem:[#allocation9] sm:$0xff]  ;;  %v1579_v10 = vld [vmem:[%s2326_s8] ss:$0 sm:$0xff]  ;;  %v761_v16 = vld [vmem:[#allocation12 + $0x18] sm:$0xff]  ;;  %s2235_s14 = scalar_lea.vmem [#allocation16], %s1423_s11  ;;  %s1946_s3 = smov 16  }
  0x53   : > { %720 = vmatpush.msra.mxu0 %v697_v3  ;;  %v693_v8 = vld [vmem:[%s580_s13] sm:$0xff]  ;;  %v760_v17 = vld [vmem:[#allocation12 + $0x10] sm:$0xff]  ;;  %781 = vmatpush.msra.mxu2 %v761_v16  ;;  %s1947_s25 = smov 8   ;;  %s1948_s30 = smov 24  }
  0x54   : > { %752 = vmatpush.msra.mxu1 %v728_v4  ;;  %v1580_v11 = vld [vmem:[%s2325_s7] ss:$0 sm:$0xff]  ;;  %v758_v19 = vld [vmem:[#allocation12] sm:$0xff]  ;;  %v694_v20 = vld [vmem:[%s590_s18] sm:$0xff]  ;;  %s1450_s16 = sshll.u32 %s1927_s24, 5  ;;  %s2375_s0 = sld [smem:[#allocation38_spill]] }
  0x55   : > { %721 = vmatpush.msra.mxu0 %v696_v5  ;;  %v759_v18 = vld [vmem:[#allocation12 + $0x8] sm:$0xff]  ;;  %782 = vmatpush.msra.mxu2 %v760_v17  ;;  %v1071_v16 = vld [vmem:[#allocation14] sm:$0xff]  ;;  %v1949_v17 = vmov 0.0   ;;  %s1146_s13 = sshll.u32 %s2235_s14, 4  ;;  %s1116_s27 = scalar_lea.sflag [#allocation17], %s2173_s21  ;;  %s1147_s13 = int_to_ptr.vmem [resolvable:$true] %s1146_s13 }
  0x56   : > { %753 = vmatpush.msra.mxu1 %v727_v6  ;;  %v1581_v29 = vld [vmem:[%s2327_s9] ss:$0 sm:$0xff]  ;;  %691 = vst.msk [vmem:[#allocation2] sm:$0xff] %vm690_vm0, %v1949_v17 }
  0x57   : > { %722 = vmatpush.msra.mxu0 %v695_v7  ;;  %1425 = vmatmul.msk.f32.vlgmr.msra.gmra.mxu1 %vm690_vm0, %v693_v8 }
  0x58   : > { %1424 = vmatmul.msk.f32.vlgmr.msra.gmra.mxu0 %vm690_vm0, %v692_v9  ;;  %783 = vmatpush.msra.mxu2 %v759_v18 }
  0x5a   : > { %784 = vmatpush.msra.mxu2 %v758_v19  ;;  %s1145_s12 = scalar_lea.hbm %s2375_s0, %s1450_s16 }
  0x5b   : > { %1426 = vmatmul.msk.f32.vlgmr.msra.gmra.mxu2 %vm690_vm0, %v694_v20  ;;  %s1148_s18 = sshll.u32 %s1145_s12, 4  ;;  %s1149_s18 = int_to_ptr.hbm [resolvable:$true] %s1148_s18 }
  0x5c   : > { %s1823_s19 = sshra.s32 %s1149_s18, 4  ;;  %s1824_s19 = int_to_ptr.hbm [resolvable:$true] %s1823_s19 }
  0x5d   : > { %s1825_s15 = scalar_lea.hbm %s1824_s19, 32  ;;  %p1830_p10 = scmp.lt.s32.totalorder %s1824_s19, %s2375_s0 }
  0x5e   : > { %p1826_p1 = scmp.ne.s32.totalorder %s1824_s19, %s1825_s15 }
  0x60   : > { %p1827_p3 = pnand %p1826_p1, %p2104_p2 }
  0x62   : > { %p1828_p5 = pneg %p1827_p3 }
  0xd4   : > { %v755_v12 = vpop.f32.mrf.mxu1 }
  0xd5   : > { %v724_v13 = vpop.f32.mrf.mxu0  ;;  %v756_v14 = vadd.f32 %v1579_v10, %v755_v12 }
  0xd6   : > { %v725_v15 = vadd.f32 %v1580_v11, %v724_v13  ;;  %v1074_v13 = vld [vmem:[#allocation14 + $0x18] sm:$0xff] }
  0xd7   : > { %988 = vrot.lane.b32.xlu2 %v756_v14, %s1943_s28  ;;  %853 = vrot.lane.b32.xlu1 %v756_v14, %s1944_s10 }
  0xd8   : > { %921 = vrot.lane.b32.xlu0 %v756_v14, %s1945_s26  ;;  %1427 = vmatpush.xpose.msk.msra.mxu3 %vm789_vm1, %v756_v14  ;;  %v1073_v14 = vld [vmem:[#allocation14 + $0x10] sm:$0xff] }
  0xdb   : > { %1428 = vmatmul.msk.f32.vlgmr.msra.gmra.mxu3 %vm789_vm1, %v725_v15 }
  0xde   : > { %v786_v30 = vpop.f32.mrf.mxu2 }
  0xdf   : > { %986 = vrot.lane.b32.xlu2 %v725_v15, %s1943_s28  ;;  %851 = vrot.lane.b32.xlu1 %v725_v15, %s1944_s10  ;;  %v787_v31 = vadd.f32 %v1581_v29, %v786_v30 }
  0xe0   : > { %919 = vrot.lane.b32.xlu0 %v725_v15, %s1945_s26  ;;  %v1072_v15 = vld [vmem:[#allocation14 + $0x8] sm:$0xff] }
  0xe1   : > { %846 = vmatpush.msrb.mxu3 %v787_v31 }
 0x131   : > { %v989_v22 = vpop.permute.xlu2 %988 }
 0x139   : > { %v987_v26 = vpop.permute.xlu2 %986 }
 0x149   : > { %v854_v21 = vpop.permute.xlu1 %853 }
 0x14a   : > { %v922_v23 = vpop.permute.xlu0 %921  ;;  %1430 = vmatpush.xpose.msk.msrb.mxu0 %vm789_vm1, %v854_v21 }
 0x14b   : > { %1434 = vmatpush.xpose.msk.msrb.mxu2 %vm789_vm1, %v922_v23 }
 0x14e   : > { %1438 = vmatpush.xpose.msk.msra.mxu0 %vm789_vm1, %v989_v22 }
 0x14f   : > { %1090 = vmatpush.msra.mxu2 %v1074_v13 }
 0x151   : > { %v852_v24 = vpop.permute.xlu1 %851  ;;  %1091 = vmatpush.msra.mxu2 %v1073_v14 }
 0x152   : > { %v920_v25 = vpop.permute.xlu0 %919  ;;  %1431 = vmatmul.msk.f32.vlgmr.msrb.gmra.mxu0 %vm789_vm1, %v852_v24 }
 0x153   : > { %1435 = vmatmul.msk.f32.vlgmr.msrb.gmra.mxu2 %vm789_vm1, %v920_v25 }
 0x154   : > { %1092 = vmatpush.msra.mxu2 %v1072_v15 }
 0x156   : > { %1093 = vmatpush.msra.mxu2 %v1071_v16 }
 0x15a   : > { %1439 = vmatmul.msk.f32.vlgmr.msra.gmra.mxu0 %vm789_vm1, %v987_v26 }
 0x15e   : > { %v813_v27 = vpop.f32.mrf.mxu3 }
 0x15f   : > { %v816_v28 = vsel %vm789_vm1, %v813_v27, -inf }
 0x160   : > { %817 = vmax.xlane.f32.xlu0 %v816_v28 }
 0x1cf   : > { %v876_v32 = vpop.f32.mrf.mxu0 }
 0x1d0   : > { %v879_v33 = vsel %vm789_vm1, %v876_v32, -inf }
 0x1d1   : > { %880 = vmax.xlane.f32.xlu1 %v879_v33 }
 0x1d3   : > { %v818_v34 = vpop.xlane.xlu0 %817 }
 0x1d4   : > { %v819_v35 = vsub.f32 %v813_v27, %v818_v34 }
 0x1d6   : > { %v820_v36 = vmul.f32 1.442695, %v819_v35  ;;  %v944_v37 = vpop.f32.mrf.mxu2 }
 0x1d7   : > { %v947_v38 = vsel %vm789_vm1, %v944_v37, -inf  ;;  %v1011_v39 = vpop.f32.mrf.mxu0 }
 0x1d8   : > { %1583 = vpow2.f32 %v820_v36  ;;  %948 = vmax.xlane.f32.xlu2 %v947_v38  ;;  %v1014_v41 = vsel %vm789_vm1, %v1011_v39, -inf }
 0x1de   : > { %v1584_v40 = vpop.eup %1583 }
 0x1df   : > { %v822_v42 = vsel %vm789_vm1, %v1584_v40, 0.0 }
 0x1e0   : > { %1015 = vmax.xlane.f32.xlu2 %v1014_v41  ;;  %823 = vadd.xlane.f32.xlu0 %v822_v42 }
 0x244   : > { %v881_v43 = vpop.xlane.xlu1 %880 }
 0x245   : > { %v882_v44 = vsub.f32 %v876_v32, %v881_v43 }
 0x247   : > { %v883_v45 = vmul.f32 1.442695, %v882_v44 }
 0x249   : > { %1585 = vpow2.f32 %v883_v45 }
 0x24b   : > { %v949_v46 = vpop.xlane.xlu2 %948 }
 0x24c   : > { %v950_v47 = vsub.f32 %v944_v37, %v949_v46 }
 0x24e   : > { %v951_v48 = vmul.f32 1.442695, %v950_v47 }
 0x24f   : > { %v1586_v49 = vpop.eup %1585 }
 0x250   : > { %1587 = vpow2.f32 %v951_v48  ;;  %v885_v50 = vsel %vm789_vm1, %v1586_v49, 0.0 }
 0x251   : > { %886 = vadd.xlane.f32.xlu1 %v885_v50 }
 0x253   : > { %v1016_v51 = vpop.xlane.xlu2 %1015  ;;  %v824_v52 = vpop.xlane.xlu0 %823 }
 0x254   : > { %v1017_v53 = vsub.f32 %v1011_v39, %v1016_v51  ;;  %1589 = vrcp.f32 %v824_v52 }
 0x256   : > { %v1588_v54 = vpop.eup %1587  ;;  %v1018_v55 = vmul.f32 1.442695, %v1017_v53 }
 0x257   : > { %v953_v56 = vsel %vm789_vm1, %v1588_v54, 0.0 }
 0x258   : > { %1591 = vpow2.f32 %v1018_v55  ;;  %954 = vadd.xlane.f32.xlu2 %v953_v56 }
 0x25a   : > { %v1590_v57 = vpop.eup %1589 }
 0x25b   : > { %v826_v58 = vmul.f32 %v1590_v57, %v1584_v40 }
 0x25d   : > { %827 = vst.msk [vmem:[%s2235_s14] sm:$0xff] %vm789_vm1, %v826_v58  ;;  %1429 = vmatmul.msk.f32.vlgmr.msrb.gmra.mxu3 %vm789_vm1, %v826_v58 }
 0x25e   : > { %v1592_v59 = vpop.eup %1591 }
 0x25f   : > { %v1020_v60 = vsel %vm789_vm1, %v1592_v59, 0.0 }
 0x260   : > { %1021 = vadd.xlane.f32.xlu0 %v1020_v60 }
 0x26a   : > { %893 = vrot.lane.b32.xlu1 %v787_v31, %s1944_s10  ;;  %s1829_s10 = scalar_lea.hbm %s2375_s0, 64 }
 0x26b   : > { %p1831_p11 = scmp.lt.s32.totalorder %s1829_s10, %s1825_s15 }
 0x26d   : > { %p1832_p12 = por %p1831_p11, %p1830_p10 }
 0x26f   : > { %p1833_p13 = pnand %p1832_p12, %p1828_p5 }
 0x270   : > { %960 = vrot.lane.b32.xlu2 %v787_v31, %s1945_s26 }
 0x274   : > { %1027 = vrot.lane.b32.xlu0 %v787_v31, %s1943_s28 }
 0x2c4   : > { %v887_v61 = vpop.xlane.xlu1 %886 }
 0x2c5   : > { %1593 = vrcp.f32 %v887_v61 }
 0x2cb   : > { %v1594_v62 = vpop.eup %1593  ;;  %v955_v63 = vpop.xlane.xlu2 %954 }
 0x2cc   : > { %1595 = vrcp.f32 %v955_v63  ;;  %v889_v0 = vmul.f32 %v1594_v62, %v1586_v49 }
 0x2ce   : > { %1432 = vst.msk [vmem:[%s2235_s14 + $0x8] sm:$0xff] %vm789_vm1, %v889_v0 }
 0x2d2   : > { %v1596_v1 = vpop.eup %1595 }
 0x2d3   : > { %v957_v2 = vmul.f32 %v1596_v1, %v1588_v54  ;;  %v961_v3 = vpop.permute.xlu2 %960  ;;  %v1022_v4 = vpop.xlane.xlu0 %1021 }
 0x2d4   : > { %1597 = vrcp.f32 %v1022_v4  ;;  %981 = vmatpush.msra.mxu3 %v961_v3 }
 0x2d5   : > { %1436 = vst.msk [vmem:[%s2235_s14 + $0x10] sm:$0xff] %vm789_vm1, %v957_v2  ;;  %1437 = vmatmul.msk.f32.vlgmr.msra.gmra.mxu3 %vm789_vm1, %v957_v2 }
 0x2da   : > { %v1598_v5 = vpop.eup %1597 }
 0x2db   : > { %v1024_v6 = vmul.f32 %v1598_v5, %v1592_v59 }
 0x2dc   : > { %v894_v7 = vpop.permute.xlu1 %893 }
 0x2dd   : > { %1440 = vst.msk [vmem:[%s2235_s14 + $0x18] sm:$0xff] %vm789_vm1, %v1024_v6  ;;  %914 = vmatpush.msrb.mxu1 %v894_v7 }
 0x2de   : > { %1433 = vmatmul.msk.f32.vlgmr.msrb.gmra.mxu1 %vm789_vm1, %v889_v0 }
 0x2e0   : > { %v848_v9 = vpop.f32.mrf.mxu3 }
 0x2e6   : > { %v1028_v8 = vpop.permute.xlu0 %1027 }
 0x2e7   : > { %1048 = vmatpush.msra.mxu1 %v1028_v8 }
 0x2e8   : > { %1441 = vmatmul.msk.f32.vlgmr.msra.gmra.mxu1 %vm789_vm1, %v1024_v6 }
 0x358   : > { %v983_v10 = vpop.f32.mrf.mxu3 }
 0x359   : > { %1058 = vrot.lane.b32.xlu0 %v983_v10, %s1946_s3 }
 0x35b   : > { %v916_v11 = vpop.f32.mrf.mxu1 }
 0x35c   : > { %1054 = vrot.lane.b32.xlu1 %v916_v11, %s1947_s25 }
 0x365   : > { %v1050_v12 = vpop.f32.mrf.mxu1 }
 0x366   : > { %1062 = vrot.lane.b32.xlu2 %v1050_v12, %s1948_s30 }
 0x3c0   : > { %v1063_v21 = vpop.permute.xlu2 %1062 }
 0x3cb   : > { %v1059_v19 = vpop.permute.xlu0 %1058 }
 0x3ce   : > { %v1055_v18 = vpop.permute.xlu1 %1054 }
 0x3cf   : > { %v1065_v20 = vsel %vm789_vm1, %v848_v9, %v1055_v18 }
 0x3d0   : > { %v1067_v22 = vsel %vm1066_vm2, %v1065_v20, %v1059_v19 }
 0x3d1   : > { %v1069_v23 = vsel %vm1068_vm3, %v1067_v22, %v1063_v21 }
 0x3d2   : > { %1442 = vmatmul.msk.f32.vlgmr.msra.gmra.mxu2 %vm690_vm0, %v1069_v23 }
 0x3d3   : > { %1836 = shalt.err (!%p1833_p13)
}
 0x3d4   : > { %s1950_s17 = smov 128   ;;  %v1070_v24 = vld [vmem:[#allocation2] sm:$0xff]  ;;  %s1445_s11 = sshll.u32 %s1927_s24, 3 }
 0x3d5   : > { %1474 = dma.vmem_to_hbm [thread:$0]  (%p2104_p2), %s1147_s13, 512, %s1149_s18, %s1116_s27, %s1950_s17, %s1950_s17, %s1947_s25  }
 0x3d6   : > { %s2376_s30 = sld [smem:[#allocation37_spill]]  ;;  %s668_s19 = scalar_lea.vmem [#allocation15], %s2176_s4 }
 0x3d7   : > { %s2377_s12 = sld [smem:[#allocation36_spill]]  ;;  %s1129_s15 = sshll.u32 %s668_s19, 4  ;;  %s1130_s15 = int_to_ptr.vmem [resolvable:$true] %s1129_s15 }
 0x3d8   : > { %s1111_s24 = scalar_lea.sflag [#allocation5], %s2173_s21 }
 0x3dc   : > { %s1127_s16 = scalar_lea.hbm %s2376_s30, %s1445_s11  ;;  %s1857_s4 = scalar_lea.hbm %s2376_s30, 16 }
 0x3dd   : > { %v1582_v27 = vld [vmem:[%s2377_s12] ss:$0 sm:$0xff]  ;;  %s1131_s20 = sshll.u32 %s1127_s16, 4  ;;  %s1132_s20 = int_to_ptr.hbm [resolvable:$true] %s1131_s20 }
 0x3de   : > { %s1851_s25 = sshra.s32 %s1132_s20, 4  ;;  %s1852_s25 = int_to_ptr.hbm [resolvable:$true] %s1851_s25 }
 0x3df   : > { %s1853_s13 = scalar_lea.hbm %s1852_s25, 8  ;;  %p1858_p8 = scmp.lt.s32.totalorder %s1852_s25, %s2376_s30 }
 0x3e0   : > { %p1854_p0 = scmp.ne.s32.totalorder %s1852_s25, %s1853_s13  ;;  %p1859_p1 = scmp.lt.s32.totalorder %s1857_s4, %s1853_s13 }
 0x3e2   : > { %p1855_p4 = pnand %p1854_p0, %p2104_p2  ;;  %p1860_p3 = por %p1859_p1, %p1858_p8 }
 0x3e4   : > { %p1856_p9 = pneg %p1855_p4 }
 0x3e6   : > { %p1861_p5 = pnand %p1860_p3, %p1856_p9 }
 0x455   : > { %v1095_v25 = vpop.f32.mrf.mxu2 }
 0x456   : > { %v1098_v26 = vadd.f32 %v1095_v25, %v1070_v24 }
 0x458   : > { %1099 = vst.msk [vmem:[#allocation2] sm:$0xff] %vm690_vm0, %v1098_v26 }
 0x45f   : > { %v1103_v28 = vld [vmem:[#allocation2] sm:$0xff] }
 0x460   : > { %v1108_v29 = vadd.f32 %v1582_v27, %v1103_v28 }
 0x462   : > { %1109 = vst.msk [vmem:[%s668_s19] sm:$0xff] %vm690_vm0, %v1108_v29 }
 0x463   : > { %1864 = shalt.err (!%p1861_p5)
}
 0x464   : > { %1473 = dma.vmem_to_hbm [thread:$0]  (%p2104_p2), %s1130_s15, 128, %s1132_s20, %s1111_s24  }
 0x465 PF: > { %s2378_s21 = sld [smem:[#allocation24_spill]]  ;;  %p1501_p10 = pnand %p1407_p6, %p2111_p7 }
 0x466   : > { %s2380_s1 = sld [smem:[#allocation26_spill]] }
 0x467   : > { %p1502_p11 = pneg %p1501_p10 }
 0x46b   : > { %s1163_s17 = sand.u32 1, %s2378_s21  }
 0x46c   : > { %s1164_s11 = scalar_lea.sflag [#allocation5], %s1163_s17 }
 0x46d   : > { %1906 = dma.done.wait (%p1502_p11), %s1164_s11, 128  }
 0x46e   : > { %1908 = vsyncadd (%p1502_p11), %s1164_s11, 4294967168  ;;  %s1174_s14 = scalar_lea.sflag [#allocation17], %s1163_s17 }
 0x46f   : > { %1910 = dma.done.wait (%p1502_p11), %s1174_s14, 512  }
 0x470   : > { %1912 = vsyncadd (%p1502_p11), %s1174_s14, 4294966784  ;;  %s37_s26 = sadd.s32 1, %s2380_s1   ;;  %s2381_s29 = sld [smem:[#allocation28_spill]] }
 0x471   : > { %p34_p12 = scmp.ge.s32.totalorder %s37_s26, 4   ;;  %s2382_s24 = sld [smem:[#allocation25_spill]] }
 0x472   : > { %s2383_s25 = sld [smem:[#allocation27_spill]]  ;;  %s2384_s21 = smov %s1919_s22 }
 0x473   : > { %s2385_s22 = smov %s1923_s23  ;;  %36 = sbr.rel (!%p34_p12) target bundleno = 22 (0x16), region = 190 }
 0x476   : > { %s2386_s23 = smov %s2381_s29 }
 0x478   :  { %1180 = vsyncpa [#allocation4], 1 }
 0x479   :  { %1182 = vsyncpa [#allocation4 + $0x1], 1 }
 0x47a   :  { %1183 = vsyncpa [#allocation7], 1 }
 0x47b   :  { %1185 = vsyncpa [#allocation7 + $0x1], 1 }
 0x47c   :  { %1186 = vsyncpa [#allocation10], 1 }
 0x47d   :  { %1187 = vsyncpa [#allocation13], 1 }
 0x47e   :  { %1188 = vsyncpa [#allocation5], 1 }
 0x47f   :  { %1190 = vsyncpa [#allocation5 + $0x1], 1 }
 0x480   :  { %1191 = vsyncpa [#allocation17], 1 }
 0x481   :  { %1193 = vsyncpa [#allocation17 + $0x1], 1 }

</bundles_post_ra>
